<compile_context>
chip_gen: v7x
topology: tpu7x:2x2x1
jax: 0.10.0
libtpu: 0.0.40
codegen_flags: <defaults>
</compile_context>

<pallas_src>
import functools

import jax
import jax.numpy as jnp
import numpy as np
from jax import lax
from jax.experimental import pallas as pl
from jax.experimental.pallas import tpu as pltpu


def _make_kmeans_kernel(n_clusters: int, max_iter: int):
    K = n_clusters

    def kernel(x_ref, proto_ref, idx_ref):
        x = x_ref[...]                                    # (N, D) f32 in VMEM
        N, D = x.shape
        iota_kn = lax.broadcasted_iota(jnp.int32, (K, N), 0)   # cluster id per row

        def nearest_center_euc(proto):
            # argmin_c ||x_i - p_c||^2 == argmin_c (||p_c||^2 - 2 p_c.x_i); sqrt
            # and the per-point ||x_i||^2 term are monotone / constant in c.
            proto_sq = jnp.sum(proto * proto, axis=-1, keepdims=True)      # (K, 1)
            cross = jnp.einsum('kd,nd->kn', proto, x,
                               preferred_element_type=jnp.float32)         # (K, N) MXU
            scores = proto_sq - 2.0 * cross                                # (K, N)
            smin = jnp.min(scores, axis=0, keepdims=True)                  # (1, N)
            # first (smallest) cluster index attaining the minimum
            idx = jnp.min(jnp.where(scores <= smin, iota_kn, K),
                          axis=0, keepdims=True)                           # (1, N)
            return idx.astype(jnp.int32)

        def update_center(idx):
            onehot = (iota_kn == idx).astype(jnp.float32)                  # (K, N)
            psum = jnp.dot(onehot, x,
                           preferred_element_type=jnp.float32)             # (K, D) MXU
            counts = jnp.sum(onehot, axis=1, keepdims=True)                # (K, 1)
            # Empty clusters: ~0 / 1e-6 -> 0, identical to the PyTorch reference.
            return psum / (counts + 1e-6)

        def cond(carry):
            it, _, _, done = carry
            return jnp.logical_and(it < max_iter, jnp.logical_not(done))

        def body(carry):
            it, proto, _, _ = carry
            idx_new = nearest_center_euc(proto)
            proto_new = update_center(idx_new)
            variation = jnp.mean((proto_new - proto) ** 2)
            # PyTorch commits (proto_new, idx_new) and *then* breaks, so the
            # final iteration's results are carried out before cond re-checks.
            return it + 1, proto_new, idx_new, variation < 1e-4

        proto0 = x[:K, :]                                 # prototypes = x[:n_cluster]
        idx0 = jnp.zeros((1, N), jnp.int32)
        _, proto_f, idx_f, _ = lax.while_loop(
            cond, body, (jnp.int32(0), proto0, idx0, jnp.bool_(False)))

        proto_ref[...] = proto_f
        idx_ref[...] = idx_f

    return kernel


@functools.partial(jax.jit, static_argnames=("n_clusters", "max_iter"))
def kmeans_forward(x, *, n_clusters=8, max_iter=50):
    """Pallas equivalent of Kmeans(n_clusters, max_iter, metric='euc').forward(x)."""
    N, D = x.shape
    K = n_clusters
    if N < K:
        raise ValueError(f"need at least n_clusters={K} points, got N={N}")
    kernel = _make_kmeans_kernel(K, max_iter)

    # TODO(synk): for large N, tile x over the sample axis (x in HBM via
    # memory_space=pl.ANY + per-tile DMA, partial psum/count accumulation) and
    # mark that grid axis "parallel" so v7x's second TensorCore participates.
    proto, idx = pl.pallas_call(
        kernel,
        out_shape=(jax.ShapeDtypeStruct((K, D), jnp.float32),
                   jax.ShapeDtypeStruct((1, N), jnp.int32)),
        grid=(1,),
        in_specs=[pl.BlockSpec((N, D), lambda i: (0, 0))],
        out_specs=(pl.BlockSpec((K, D), lambda i: (0, 0)),
                   pl.BlockSpec((1, N), lambda i: (0, 0))),
        compiler_params=pltpu.CompilerParams(
            dimension_semantics=("arbitrary",),
            vmem_limit_bytes=32 * 1024 * 1024),
    )(x.astype(jnp.float32))
    # PyTorch returns (prototypes, nearest_idx) with idx of shape (N,)
    return proto, idx.reshape(N)


def _reference_kmeans(x, n_clusters, max_iter):
    """Pure-numpy mirror of the PyTorch forward (euclidean metric, exact form)."""
    x = np.asarray(x, dtype=np.float32)
    N = x.shape[0]
    K = n_clusters
    proto = x[:K].copy()
    idx = np.zeros(N, np.int64)
    for _ in range(max_iter):
        dist = np.sqrt(((x[:, None, :] - proto[None, :, :]) ** 2).sum(-1))
        idx = dist.argmin(-1)
        onehot = np.zeros((K, N), np.float32)
        onehot[idx, np.arange(N)] = 1.0
        proto_new = onehot @ x / (onehot.sum(1, keepdims=True) + 1e-6)
        variation = ((proto_new - proto) ** 2).mean()
        proto = proto_new
        if variation < 1e-4:
            break
    return proto, idx


if __name__ == "__main__":
    # Deterministic synthetic data with clear (well-separated) cluster structure.
    key = jax.random.PRNGKey(0)
    k_centers, k_noise = jax.random.split(key)

    N, D, K, MAX_ITER = 64, 32, 8, 50
    centers = 3.0 * jax.random.normal(k_centers, (K, D), dtype=jnp.float32)
    assign = jnp.arange(N) % K
    x = centers[assign] + 0.1 * jax.random.normal(k_noise, (N, D), dtype=jnp.float32)

    protos, idx = kmeans_forward(x, n_clusters=K, max_iter=MAX_ITER)
    jax.block_until_ready((protos, idx))

    # Sanity-check against a pure-numpy mirror of the PyTorch algorithm.
    ref_protos, ref_idx = _reference_kmeans(x, K, MAX_ITER)
    np.testing.assert_array_equal(np.asarray(idx), ref_idx.astype(np.int32))
    np.testing.assert_allclose(np.asarray(protos), ref_protos, rtol=1e-3, atol=1e-3)

    print("KERNEL_OK")
</pallas_src>

<mosaic_0001>
module attributes {stable_mosaic.version = 11 : i64} {
  func.func @kernel(%arg0: i32, %arg1: memref<64x32xf32, #tpu.memory_space<vmem>>, %arg2: memref<8x32xf32, #tpu.memory_space<vmem>>, %arg3: memref<1x64xi32, #tpu.memory_space<vmem>>) attributes {dimension_semantics = [#tpu.dimension_semantics<arbitrary>], iteration_bounds = array<i64: 1>, scalar_prefetch = 0 : i64, scratch_operands = 0 : i64, tpu.core_type = #tpu.core_type<tc>, window_params = [{pipeline_mode = #tpu.pipeline_mode<synchronous>, transform_indices = @transform_0, window_bounds = array<i64: 64, 32>}, {pipeline_mode = #tpu.pipeline_mode<synchronous>, transform_indices = @transform_1, window_bounds = array<i64: 8, 32>}, {pipeline_mode = #tpu.pipeline_mode<synchronous>, transform_indices = @transform_2, window_bounds = array<i64: 1, 64>}]} {
    %c0 = arith.constant 0 : index
    %c0_0 = arith.constant 0 : index
    %0 = vector.load %arg1[%c0, %c0_0] : memref<64x32xf32, #tpu.memory_space<vmem>>, vector<64x32xf32>
    %1 = tpu.iota {dimensions = array<i32: 0>} : vector<8x64xi32>
    %2 = vector.extract_strided_slice %0 {offsets = [0, 0], sizes = [8, 32], strides = [1, 1]} : vector<64x32xf32> to vector<8x32xf32>
    %c0_i32 = arith.constant 0 : i32
    %3 = vector.broadcast %c0_i32 : i32 to vector<1x64xi32>
    %c0_i32_1 = arith.constant 0 : i32
    %false = arith.constant false
    %4:4 = scf.while (%arg4 = %c0_i32_1, %arg5 = %2, %arg6 = %3, %arg7 = %false) : (i32, vector<8x32xf32>, vector<1x64xi32>, i1) -> (i32, vector<8x32xf32>, vector<1x64xi32>, i1) {
      %c50_i32 = arith.constant 50 : i32
      %7 = arith.cmpi slt, %arg4, %c50_i32 : i32
      %true = arith.constant true
      %8 = arith.xori %arg7, %true : i1
      %9 = arith.andi %7, %8 : i1
      scf.condition(%9) %arg4, %arg5, %arg6, %arg7 : i32, vector<8x32xf32>, vector<1x64xi32>, i1
    } do {
    ^bb0(%arg4: i32, %arg5: vector<8x32xf32>, %arg6: vector<1x64xi32>, %arg7: i1):
      %7 = arith.mulf %arg5, %arg5 : vector<8x32xf32>
      %cst = arith.constant dense<0.000000e+00> : vector<8xf32>
      %8 = vector.multi_reduction <add>, %7, %cst [1] : vector<8x32xf32> to vector<8xf32>
      %9 = vector.shape_cast %8 : vector<8xf32> to vector<8x1xf32>
      "tpu.trace_start"() <{level = 10 : i32, message = "kd,nd->kn"}> : () -> ()
      %cst_6 = arith.constant dense<0.000000e+00> : vector<8x64xf32>
      %10 = tpu.matmul %arg5, %0, %cst_6 {dimension_numbers = #tpu.dot_dimension_numbers<[1], [1], [0], [0], [0, 0, 1, 0], [], []>} : vector<8x32xf32>, vector<64x32xf32>, vector<8x64xf32> -> vector<8x64xf32>
      "tpu.trace_stop"() : () -> ()
      %cst_7 = arith.constant 2.000000e+00 : f32
      %11 = vector.broadcast %cst_7 : f32 to vector<8x64xf32>
      %12 = arith.mulf %11, %10 : vector<8x64xf32>
      %13 = vector.broadcast %9 : vector<8x1xf32> to vector<8x64xf32>
      %14 = arith.subf %13, %12 : vector<8x64xf32>
      %cst_8 = arith.constant dense<0x7F800000> : vector<64xf32>
      %15 = vector.multi_reduction <minimumf>, %14, %cst_8 [0] : vector<8x64xf32> to vector<64xf32>
      %16 = vector.shape_cast %15 : vector<64xf32> to vector<1x64xf32>
      %17 = vector.broadcast %16 : vector<1x64xf32> to vector<8x64xf32>
      %18 = arith.cmpf ole, %14, %17 : vector<8x64xf32>
      %c8_i32 = arith.constant 8 : i32
      %19 = vector.broadcast %c8_i32 : i32 to vector<8x64xi32>
      %20 = arith.select %18, %1, %19 : vector<8x64xi1>, vector<8x64xi32>
      %cst_9 = arith.constant dense<2147483647> : vector<64xi32>
      %21 = vector.multi_reduction <minsi>, %20, %cst_9 [0] : vector<8x64xi32> to vector<64xi32>
      %22 = vector.shape_cast %21 : vector<64xi32> to vector<1x64xi32>
      %23 = vector.broadcast %22 : vector<1x64xi32> to vector<8x64xi32>
      %24 = arith.cmpi eq, %1, %23 : vector<8x64xi32>
      %25 = arith.extui %24 : vector<8x64xi1> to vector<8x64xi32>
      %26 = arith.sitofp %25 : vector<8x64xi32> to vector<8x64xf32>
      %cst_10 = arith.constant dense<0.000000e+00> : vector<8x32xf32>
      %27 = tpu.matmul %26, %0, %cst_10 {dimension_numbers = #tpu.dot_dimension_numbers<[1], [0], [0], [1], [0, 0, 1, 1], [], []>} : vector<8x64xf32>, vector<64x32xf32>, vector<8x32xf32> -> vector<8x32xf32>
      %cst_11 = arith.constant dense<0.000000e+00> : vector<8xf32>
      %28 = vector.multi_reduction <add>, %26, %cst_11 [1] : vector<8x64xf32> to vector<8xf32>
      %29 = vector.shape_cast %28 : vector<8xf32> to vector<8x1xf32>
      %cst_12 = arith.constant 9.99999997E-7 : f32
      %30 = vector.broadcast %cst_12 : f32 to vector<8x1xf32>
      %31 = arith.addf %29, %30 : vector<8x1xf32>
      %32 = vector.broadcast %31 : vector<8x1xf32> to vector<8x32xf32>
      %33 = arith.divf %27, %32 : vector<8x32xf32>
      %34 = arith.subf %33, %arg5 : vector<8x32xf32>
      %35 = arith.mulf %34, %34 : vector<8x32xf32>
      %36 = vector.shape_cast %35 : vector<8x32xf32> to vector<1x8x32xf32>
      %cst_13 = arith.constant dense<0.000000e+00> : vector<1xf32>
      %37 = vector.multi_reduction <add>, %36, %cst_13 [1, 2] : vector<1x8x32xf32> to vector<1xf32>
      %38 = vector.shape_cast %37 : vector<1xf32> to vector<1x1x1xf32>
      %39 = vector.extract %38[0, 0, 0] : f32 from vector<1x1x1xf32>
      %cst_14 = arith.constant 2.560000e+02 : f32
      %40 = arith.divf %39, %cst_14 : f32
      %c1_i32 = arith.constant 1 : i32
      %41 = arith.addi %arg4, %c1_i32 : i32
      %cst_15 = arith.constant 9.99999974E-5 : f32
      %42 = arith.cmpf olt, %40, %cst_15 : f32
      scf.yield %41, %33, %22, %42 : i32, vector<8x32xf32>, vector<1x64xi32>, i1
    }
    %c0_2 = arith.constant 0 : index
    %c0_3 = arith.constant 0 : index
    %5 = vector.load %arg2[%c0_2, %c0_3] : memref<8x32xf32, #tpu.memory_space<vmem>>, vector<8x32xf32>
    tpu.vector_store %arg2[%c0_2, %c0_3], %4#1 {strides = array<i32>} : memref<8x32xf32, #tpu.memory_space<vmem>>, vector<8x32xf32>,
    %c0_4 = arith.constant 0 : index
    %c0_5 = arith.constant 0 : index
    %6 = vector.load %arg3[%c0_4, %c0_5] : memref<1x64xi32, #tpu.memory_space<vmem>>, vector<1x64xi32>
    tpu.vector_store %arg3[%c0_4, %c0_5], %4#2 {strides = array<i32>} : memref<1x64xi32, #tpu.memory_space<vmem>>, vector<1x64xi32>,
    return
  }
  func.func @transform_0(%arg0: i32) -> (i32, i32) {
    %c0_i32 = arith.constant 0 : i32
    %c0_i32_0 = arith.constant 0 : i32
    %c0_i32_1 = arith.constant 0 : i32
    return %c0_i32, %c0_i32_0 : i32, i32
  }
  func.func @transform_1(%arg0: i32) -> (i32, i32) {
    %c0_i32 = arith.constant 0 : i32
    %c0_i32_0 = arith.constant 0 : i32
    %c0_i32_1 = arith.constant 0 : i32
    return %c0_i32, %c0_i32_0 : i32, i32
  }
  func.func @transform_2(%arg0: i32) -> (i32, i32) {
    %c0_i32 = arith.constant 0 : i32
    %c0_i32_0 = arith.constant 0 : i32
    %c0_i32_1 = arith.constant 0 : i32
    return %c0_i32, %c0_i32_0 : i32, i32
  }
}

</mosaic_0001>

<bundles_post_ra>
// kernel: kmeans_forward.1
= control target key start
LH: loop header
LB: loop body
LE: loop exit
PB: predicated region body
PF: predicated region fallthrough
CT: control target
= control target key end

     0   :  { %8 = vsyncpa [#allocation3], 0  ;;  %s624_s0 = inlined_call_operand.vmem [shape: f32[64,32], index: 0, kind: input, shape index: {}]   ;;  %s625_s1 = inlined_call_operand.hbm [shape: f32[8,32], index: 1, kind: output, shape index: {0}]   ;;  %s626_s2 = inlined_call_operand.hbm [shape: s32[1,64], index: 2, kind: output, shape index: {1}]  }
   0x1   :  { %9 = vsyncpa [#allocation5], 0  ;;  %v509_v0 = vld [vmem:[%s624_s0] sm:$0xff]   ;;  %v514_v1 = vld [vmem:[%s624_s0 + $0x8] sm:$0xff]  ;;  %v20_v2 = vlaneseq  ;;  %s551_s25 = smov 0  }
   0x2   :  { %v519_v3 = vld [vmem:[%s624_s0 + $0x10] sm:$0xff]  ;;  %v524_v4 = vld [vmem:[%s624_s0 + $0x18] sm:$0xff]  ;;  %v529_v5 = vld [vmem:[%s624_s0 + $0x20] sm:$0xff]  ;;  %v627_v10 = vmov %v509_v0 }
   0x3   :  { %v534_v6 = vld [vmem:[%s624_s0 + $0x28] sm:$0xff]  ;;  %v539_v7 = vld [vmem:[%s624_s0 + $0x30] sm:$0xff]  ;;  %v544_v8 = vld [vmem:[%s624_s0 + $0x38] sm:$0xff]  ;;  %v546_v9 = vshrl.u32 %v20_v2, 7 }
   0x4 LB: > { %vm34_vm0 = vcmask 261120   ;;  %v370_v11 = vpack.c.bf16 %v514_v1, %v509_v0  ;;  %v486_v12 = vmov 0.0|0.0   ;;  %vm487_vm2 = vmmov 0   ;;  %s254_s25 = sadd.s32 1, %s484_s25   ;;  %s484_s25 = sphi %s551_s25, %s254_s25   ;;  %v480_v10 = vphi %v627_v10, %v630_v10  }
   0x5   : > { %369 = vmatprep.subr.bf16.mxu0 %v486_v12  ;;  %vm563_vm1 = vmpackc.low %vm34_vm0, %vm34_vm0  ;;  %385 = vmatprep.subr.bf16.mxu1 %v486_v12  ;;  %v488_v14 = vmov 0.0   ;;  %v33_v15 = vmul.f32 %v480_v10, %v480_v10  ;;  %v374_v16 = vpack.c.bf16 %v524_v4, %v519_v3  ;;  %v378_v18 = vpack.c.bf16 %v534_v6, %v529_v5  ;;  %p27_p1 = scmp.lt.s32.totalorder %s254_s25, 50 }
   0x6   : > { %372 = vmatpush3.bf16.xpose.msk.msra.mxu0 %vm563_vm1, %v370_v11  ;;  %347 = vmatprep.mubr.msk.f32.mxu0 %vm487_vm2, %v488_v14  ;;  %v382_v19 = vpack.c.bf16 %v544_v8, %v539_v7  ;;  %vm137_vm3 = vcmask 523264  }
   0x7   : > { %373 = vmatprep.subr.bf16.mxu0 %v486_v12  ;;  %387 = vmatpush3.bf16.msra.mxu1 %v370_v11  ;;  %v35_v17 = vsel %vm34_vm0, %v33_v15, 0.0 }
   0x8   : > { %388 = vmatprep.subr.bf16.mxu1 %v486_v12  ;;  %366 = vmatprep.mubr.msk.f32.mxu1 %vm487_vm2, %v488_v14 }
   0x9   : > { %36 = vadd.xlane.f32.xlu0 %v35_v17 }
   0xb   : > { %390 = vmatpush3.bf16.msra.mxu1 %v374_v16 }
   0xc   : > { %391 = vmatprep.subr.bf16.mxu1 %v486_v12 }
   0xe   : > { %376 = vmatpush3.bf16.xpose.msk.msra.mxu0 %vm563_vm1, %v374_v16 }
   0xf   : > { %377 = vmatprep.subr.bf16.mxu0 %v486_v12  ;;  %393 = vmatpush3.bf16.msra.mxu1 %v378_v18 }
  0x10   : > { %394 = vmatprep.subr.bf16.mxu1 %v486_v12 }
  0x13   : > { %396 = vmatpush3.bf16.msra.mxu1 %v382_v19 }
  0x16   : > { %380 = vmatpush3.bf16.xpose.msk.msra.mxu0 %vm563_vm1, %v378_v18 }
  0x17   : > { %381 = vmatprep.subr.bf16.mxu0 %v486_v12 }
  0x1e   : > { %384 = vmatpush3.bf16.xpose.msk.msra.mxu0 %vm563_vm1, %v382_v19 }
  0x25   : > { %348 = vmatmul.mubr.msk.f32.vlgmr.msra.gmra.mrb[0].mxu0 %vm34_vm0, %v480_v10 }
  0x96   : > { %v37_v21 = vpop.xlane.xlu0 %36 }
  0xf8   : > { %v131_v20 = vpop.f32.mrb[0].mxu0 }
  0xf9   : > { %v135_v22 = vmul.f32 2.0, %v131_v20  ;;  %v349_v23 = vpop.f32.mrb[1].mxu0 }
  0xfb   : > { %v136_v24 = vsub.f32 %v37_v21, %v135_v22 }
  0xfd   : > { %v138_v25 = vsel %vm137_vm3, %v136_v24, inf }
  0xfe   : > { %v139_v26 = vrot.slane %v138_v25, 4 }
 0x100   : > { %v140_v27 = vmin.f32 %v138_v25, %v139_v26 }
 0x102   : > { %v141_v28 = vrot.slane %v140_v27, 2 }
 0x104   : > { %v142_v29 = vmin.f32 %v140_v27, %v141_v28 }
 0x106   : > { %v143_v30 = vrot.slane %v142_v29, 1 }
 0x108   : > { %v144_v31 = vmin.f32 %v142_v29, %v143_v30 }
 0x10a   : > { %vm145_vm4 = vcmp.le.f32.partialorder %v136_v24, %v144_v31 }
 0x10b   : > { %v146_v32 = vsel %vm145_vm4, %v546_v9, 8 }
 0x10c   : > { %v147_v33 = vsel %vm137_vm3, %v146_v32, 2147483647 }
 0x10d   : > { %v148_v34 = vrot.slane %v147_v33, 4 }
 0x10f   : > { %vm149_vm5 = vcmp.lt.s32.totalorder %v147_v33, %v148_v34 }
 0x110   : > { %v150_v35 = vsel %vm149_vm5, %v147_v33, %v148_v34 }
 0x111   : > { %v151_v36 = vrot.slane %v150_v35, 2 }
 0x113   : > { %vm152_vm6 = vcmp.lt.s32.totalorder %v150_v35, %v151_v36 }
 0x114   : > { %v153_v37 = vsel %vm152_vm6, %v150_v35, %v151_v36 }
 0x115   : > { %v154_v38 = vrot.slane %v153_v37, 1 }
 0x117   : > { %vm155_vm7 = vcmp.lt.s32.totalorder %v153_v37, %v154_v38 }
 0x118   : > { %v156_v39 = vsel %vm155_vm7, %v153_v37, %v154_v38 }
 0x119   : > { %vm157_vm8 = vcmp.eq.s32.totalorder %v546_v9, %v156_v39 }
 0x11a   : > { %v311_v40 = vsel %vm157_vm8, 1.0, %v488_v14 }
 0x11b   : > { %367 = vmatmul.mubr.msk.f32.vlgmr.msra.gmra.mrb[0].mxu1 %vm137_vm3, %v311_v40  ;;  %v233_v41 = vsel %vm137_vm3, %v311_v40, 0.0 }
 0x11c   : > { %234 = vadd.xlane.f32.xlu0 %v233_v41 }
 0x1a9   : > { %v235_v42 = vpop.xlane.xlu0 %234 }
 0x1aa   : > { %v236_v43 = vadd.f32 1e-06, %v235_v42 }
 0x1ac   : > { %420 = vrcp.f32 %v236_v43 }
 0x1b6   : > { %v421_v44 = vpop.eup %420 }
 0x1ee   : > { %v229_v45 = vpop.f32.mrb[0].mxu1 }
 0x1ef   : > { %v238_v46 = vmul.f32 %v421_v44, %v229_v45   ;;  %v368_v47 = vpop.f32.mrb[1].mxu1 }
 0x1f1   : > { %v239_v48 = vsub.f32 %v238_v46, %v480_v10  ;;  %v630_v10 = vmov %v238_v46 }
 0x1f3   : > { %v240_v49 = vmul.f32 %v239_v48, %v239_v48 }
 0x1f5   : > { %v241_v50 = vsel %vm34_vm0, %v240_v49, 0.0 }
 0x1f6   : > { %242 = vadd.xlane.f32.xlu1 %v241_v50 }
 0x283   : > { %v243_v51 = vpop.xlane.xlu1 %242 }
 0x284   : > { %v244_v52 = vrot.slane %v243_v51, 4 }
 0x286   : > { %v245_v53 = vadd.f32 %v244_v52, %v243_v51 }
 0x288   : > { %v246_v54 = vrot.slane %v245_v53, 2 }
 0x28a   : > { %v247_v55 = vadd.f32 %v246_v54, %v245_v53 }
 0x28c   : > { %v248_v56 = vrot.slane %v247_v55, 1 }
 0x28e   : > { %v249_v57 = vadd.f32 %v248_v56, %v247_v55 }
 0x290   : > { %397 = vpush %v249_v57 }
 0x2c1   : > { %s398_s0 = spop %397 }
 0x2c2   : > { %s253_s26 = smul.f32 0.00390625, %s398_s0 }
 0x2c4   : > { %p255_p0 = scmp.lt.f32.partialorder %s253_s26, 0.0001 }
 0x2c6   : > { %p28_p2 = pneg %p255_p0 }
 0x2c8   : > { %p29_p3 = pnand %p28_p2, %p27_p1 }
 0x2c9   :  { %257 = vst.msk [vmem:[#allocation2] sm:$0xff] (%p29_p3), %vm34_vm0, %v238_v46  ;;  %vm258_vm9 = vcmask (%p29_p3), 516096   ;;  %s489_s27 = smov (%p29_p3), [#allocation2]   ;;  %s490_s29 = smov (%p29_p3), [#allocation4]  }
 0x2ca   :  { %32 = sbr.rel (!%p29_p3) target bundleno = 4 (0x4), region = 39  ;;  %259 = vst.msk [vmem:[#allocation4] sm:$0x1] (%p29_p3), %vm258_vm9, %v156_v39  ;;  %s266_s28 = sshll.u32 (%p29_p3), %s489_s27, 4  ;;  %s267_s28 = int_to_ptr.vmem [resolvable:$true] %s266_s28 }
 0x2cb   :  { %s276_s30 = sshll.u32 (%p29_p3), %s490_s29, 4  ;;  %s422_s3 = scalar_lea.vmem (%p29_p3), %s267_s28, 128  ;;  %s277_s30 = int_to_ptr.vmem [resolvable:$true] %s276_s30 }
 0x2cc   :  { %p423_p4 = scmp.ne.s32.totalorder (%p29_p3), %s267_s28, %s422_s3  ;;  %p427_p5 = scmp.lt.s32.totalorder (%p29_p3), %s267_s28, %s267_s28 }
 0x2cd   :  { %p428_p6 = scmp.lt.s32.totalorder (%p29_p3), %s422_s3, %s422_s3 }
 0x2cf   :  { %p429_p7 = por (%p29_p3), %p428_p6, %p427_p5 }
 0x2d1   :  { %p430_p8 = pnand %p429_p7, %p423_p4 }
 0x2d3   :  { %433 = shalt.err (!%p430_p8)
}
 0x2d4   :  { %s434_s6 = scalar_lea.hbm %s625_s1, 128 }
 0x2d5   :  { %p435_p9 = scmp.ne.s32.totalorder %s625_s1, %s434_s6  ;;  %p438_p10 = scmp.lt.u32.totalorder %s434_s6, %s625_s1 }
 0x2d7   :  { %p440_p11 = pnand %p438_p10, %p435_p9 }
 0x2d9   :  { %443 = shalt.err (!%p440_p11)
}
 0x2da   :  { %269 = dma.vmem_to_hbm [thread:$0]  %s267_s28, 128, %s625_s1, [#allocation3]  }
 0x2db   :  { %s444_s13 = scalar_lea.vmem %s277_s30, 16  ;;  %s448_s14 = scalar_lea.vmem %s277_s30, 32 }
 0x2dc   :  { %p445_p12 = scmp.ne.s32.totalorder %s277_s30, %s444_s13  ;;  %p449_p13 = scmp.lt.s32.totalorder %s277_s30, %s277_s30 }
 0x2dd   :  { %p450_p0 = scmp.lt.s32.totalorder %s448_s14, %s444_s13 }
 0x2df   :  { %p451_p1 = por %p450_p0, %p449_p13 }
 0x2e1   :  { %p452_p2 = pnand %p451_p1, %p445_p12 }
 0x2e3   :  { %455 = shalt.err (!%p452_p2)
}
 0x2e4   :  { %s456_s17 = scalar_lea.hbm %s626_s2, 16 }
 0x2e5   :  { %p457_p3 = scmp.ne.s32.totalorder %s626_s2, %s456_s17  ;;  %p460_p4 = scmp.lt.u32.totalorder %s456_s17, %s626_s2 }
 0x2e7   :  { %p462_p5 = pnand %p460_p4, %p457_p3 }
 0x2e9   :  { %465 = shalt.err (!%p462_p5)
}
 0x2ea   :  { %279 = dma.vmem_to_hbm [thread:$0]  %s277_s30, 16, %s626_s2, [#allocation5]  }
 0x2eb   :  { %474 = dma.done.wait [#allocation3], 128  }
 0x2ec   :  { %475 = vsyncadd [#allocation3], 4294967168 }
 0x2ed   :  { %476 = dma.done.wait [#allocation5], 16  }
 0x2ee   :  { %477 = vsyncadd [#allocation5], 4294967280 }
 0x2ef   :  { %286 = vsyncpa [#allocation3], 1 }
 0x2f0   :  { %287 = vsyncpa [#allocation5], 1 }

</bundles_post_ra>
